<compile_context>
chip_gen: v7x
topology: tpu7x:2x2x1
jax: 0.10.0
libtpu: 0.0.40
codegen_flags: <defaults>
</compile_context>

<pallas_src>
import functools

import jax
import jax.numpy as jnp
import numpy as np
from jax.experimental import pallas as pl
from jax.experimental.pallas import tpu as pltpu


def _combine_subpixel_weights(weight_oihw):
    """(O, I, 3, 3) PyTorch conv weight -> (2, 2, 2, 2, I, O) sub-pixel 2x2 weights.

    Result index order: [p, q, dr, dc, ci, co], where (p, q) is the output
    sub-pixel phase and (dr, dc) the effective 2x2 tap over the *original*
    resolution input (because nearest-x2 duplicates rows/cols, adjacent 3x3 taps
    that land on the same source pixel are pre-summed).
    """
    c_out, c_in = weight_oihw.shape[0], weight_oihw.shape[1]
    w = jnp.transpose(weight_oihw, (2, 3, 1, 0))                 # (kh, kw, I, O)

    def row_comb(wh, p):                                         # combine kh taps
        if p == 0:
            return jnp.stack([wh[0], wh[1] + wh[2]], axis=0)     # (2, 3, I, O)
        return jnp.stack([wh[0] + wh[1], wh[2]], axis=0)

    blocks = []
    for p in range(2):
        wr = row_comb(w, p)
        for q in range(2):                                       # combine kw taps
            if q == 0:
                wc = jnp.stack([wr[:, 0], wr[:, 1] + wr[:, 2]], axis=1)
            else:
                wc = jnp.stack([wr[:, 0] + wr[:, 1], wr[:, 2]], axis=1)
            blocks.append(wc)                                    # (2, 2, I, O)
    w4 = jnp.stack(blocks, axis=0)                               # (4, 2, 2, I, O)
    return w4.reshape(2, 2, 2, 2, c_in, c_out)                   # [p,q,dr,dc,ci,co]


def _build_row_matmul_weights(weight_oihw, w_spatial):
    """Fold column taps + column zero-padding + q-interleave + channel mix.

    Returns M of shape (2, 2, W*C, 2*W*C) with
        M[p, dr, (jj, ci), (j, q, co)] = W2[p, q, dr, dc, ci, co]   if jj = j+q+dc-1
    so a single matmul of an (unpadded) input row-slab against M[p, dr] directly
    produces the q-interleaved output row slab for row-phase p.  Taps whose source
    column jj falls outside [0, W) hit the conv's zero padding and are dropped,
    i.e. the column halo lives entirely inside the weights.
    """
    W = w_spatial
    w2 = _combine_subpixel_weights(weight_oihw)                  # [p,q,dr,dc,ci,co]
    c = w2.shape[-1]
    # P[jj, j, q, dc] = 1 iff unpadded input column jj feeds output column (j, q)
    # through column tap dc (jj = j + q + dc - 1).  Static, built with numpy.
    P = np.zeros((W, W, 2, 2), np.float32)
    for j in range(W):
        for q in range(2):
            for dc in range(2):
                jj = j + q + dc - 1
                if 0 <= jj < W:
                    P[jj, j, q, dc] = 1.0
    # rows = (jj, ci), cols = (j, q, co)
    m = jnp.einsum('Zjqd,pqrdio->prZijqo', P, w2)
    return m.reshape(2, 2, W * c, 2 * W * c)


def _upsample_row_matmul_kernel(h, w, c, x_ref, m_ref, b_ref, o_ref, pad_ref):
    """One (batch, row-phase p) grid step.

    x_ref:   (1, H, W*C)            unpadded NHWC input, (j, c) folded on lanes
    m_ref:   (1, 2, W*C, 2*W*C)     spatialised weights for this p, indexed [0, dr]
    b_ref:   (1, 2*W*C)             bias tiled over (j, q)
    o_ref:   (1, H, 2*W*C)          output slab for this p, order [i][j][q][c]
    pad_ref: (H+2, W*C)             VMEM scratch: input rows with 1-row zero halo
    """
    p = pl.program_id(1)

    # Row halo only (column padding is folded into the weights): zero the two
    # halo rows, then a full lane-width, lane-aligned copy of the input rows.
    zero_row = jnp.zeros((1, w * c), pad_ref.dtype)
    pad_ref[0:1, :] = zero_row
    pad_ref[h + 1:h + 2, :] = zero_row
    pad_ref[1:h + 1, :] = x_ref[0]

    acc = jnp.zeros((h, 2 * w * c), jnp.float32)
    for dr in range(2):                                  # 2 effective row taps
        lhs = pad_ref[pl.ds(p + dr, h), :]               # (H, W*C)
        acc = acc + jnp.dot(lhs, m_ref[0, dr],
                            preferred_element_type=jnp.float32)
    # Single lane-dense (H, 2*W*C) store.
    o_ref[0] = (acc + b_ref[...]).astype(o_ref.dtype)


@jax.jit
def upsample_forward(x_nchw, weight_oihw, bias):
    """Equivalent of UpSample.forward: nearest x2 upsample + Conv2d(C, C, 3, pad=1)."""
    b, c, h, w = x_nchw.shape
    lanes = 2 * w * c                                    # output slab lane width
    assert lanes % 128 == 0, "fast path assumes 2*W*C is a multiple of 128"

    # ---- interface glue: NCHW -> NHWC with (j, c) folded onto lanes -------------
    x = jnp.transpose(x_nchw, (0, 2, 3, 1)).reshape(b, h, w * c)

    # ---- constant weight / bias layouts (tiny, trace-time shapes) ---------------
    m = _build_row_matmul_weights(weight_oihw, w).astype(x.dtype)  # (2,2,WC,2WC)
    bias_row = jnp.tile(bias, 2 * w).reshape(1, lanes).astype(x.dtype)

    kernel = functools.partial(_upsample_row_matmul_kernel, h, w, c)

    out = pl.pallas_call(
        kernel,
        out_shape=jax.ShapeDtypeStruct((b, h, 2 * lanes), x.dtype),
        grid_spec=pltpu.PrefetchScalarGridSpec(
            num_scalar_prefetch=0,
            grid=(b, 2),                                  # (batch, row-phase p)
            in_specs=[
                pl.BlockSpec((1, h, w * c), lambda bi, p: (bi, 0, 0)),
                pl.BlockSpec((1, 2, w * c, lanes), lambda bi, p: (p, 0, 0, 0)),
                pl.BlockSpec((1, lanes), lambda bi, p: (0, 0)),
            ],
            out_specs=pl.BlockSpec((1, h, lanes), lambda bi, p: (bi, 0, p)),
            scratch_shapes=[pltpu.VMEM((h + 2, w * c), x.dtype)],
        ),
        compiler_params=pltpu.CompilerParams(
            dimension_semantics=("parallel", "parallel")),
    )(x, m, bias_row)

    # ---- free interleave: memory order is already [b][i][p][j][q][c] ------------
    out_nhwc = out.reshape(b, 2 * h, 2 * w, c)
    return jnp.transpose(out_nhwc, (0, 3, 1, 2))          # back to NCHW (interface)


if __name__ == "__main__":
    key = jax.random.PRNGKey(0)
    kx, kw, kb = jax.random.split(key, 3)

    B, C, H, W = 2, 4, 16, 16
    x = jax.random.normal(kx, (B, C, H, W), jnp.float32)
    # deterministic synthetic parameters (PyTorch Conv2d(C, C, 3): OIHW weight, (C,) bias)
    weight = jax.random.normal(kw, (C, C, 3, 3), jnp.float32) * 0.1
    bias = jax.random.normal(kb, (C,), jnp.float32) * 0.1

    out = jax.block_until_ready(upsample_forward(x, weight, bias))
    assert out.shape == (B, C, 2 * H, 2 * W), out.shape

    # pure-JAX reference with identical semantics to the PyTorch module
    up = jnp.repeat(jnp.repeat(x, 2, axis=2), 2, axis=3)
    ref = jax.lax.conv_general_dilated(
        up, weight, window_strides=(1, 1), padding=((1, 1), (1, 1)),
        dimension_numbers=('NCHW', 'OIHW', 'NCHW'),
        precision=jax.lax.Precision.HIGHEST) + bias.reshape(1, C, 1, 1)
    err = float(jnp.max(jnp.abs(out - ref)))
    # Default (fast) MXU precision => bf16-level rounding of the matmul inputs;
    # tolerance sized accordingly (f32 accumulation throughout).
    assert jnp.allclose(out, ref, rtol=2e-2, atol=2e-2), err

    print("KERNEL_OK")
</pallas_src>

<mosaic_0001>
module attributes {stable_mosaic.version = 11 : i64} {
  func.func @_upsample_row_matmul_kernel(%arg0: i32, %arg1: i32, %arg2: memref<1x16x64xf32, #tpu.memory_space<vmem>>, %arg3: memref<1x2x64x128xf32, #tpu.memory_space<vmem>>, %arg4: memref<1x128xf32, #tpu.memory_space<vmem>>, %arg5: memref<1x16x128xf32, #tpu.memory_space<vmem>>, %arg6: memref<18x64xf32, #tpu.memory_space<vmem>>) attributes {dimension_semantics = [#tpu.dimension_semantics<parallel>, #tpu.dimension_semantics<parallel>], iteration_bounds = array<i64: 2, 2>, scalar_prefetch = 0 : i64, scratch_operands = 1 : i64, tpu.core_type = #tpu.core_type<tc>, window_params = [{transform_indices = @transform_0, window_bounds = array<i64: 1, 16, 64>}, {transform_indices = @transform_1, window_bounds = array<i64: 1, 2, 64, 128>}, {pipeline_mode = #tpu.pipeline_mode<synchronous>, transform_indices = @transform_2, window_bounds = array<i64: 1, 128>}, {transform_indices = @transform_3, window_bounds = array<i64: 1, 16, 128>}]} {
    %cst = arith.constant 0.000000e+00 : f32
    %0 = vector.broadcast %cst : f32 to vector<1x64xf32>
    %c0 = arith.constant 0 : index
    %c0_0 = arith.constant 0 : index
    %1 = vector.load %arg6[%c0, %c0_0] : memref<18x64xf32, #tpu.memory_space<vmem>>, vector<1x64xf32>
    tpu.vector_store %arg6[%c0, %c0_0], %0 {strides = array<i32>} : memref<18x64xf32, #tpu.memory_space<vmem>>, vector<1x64xf32>,
    %c17 = arith.constant 17 : index
    %c0_1 = arith.constant 0 : index
    %2 = vector.load %arg6[%c17, %c0_1] : memref<18x64xf32, #tpu.memory_space<vmem>>, vector<1x64xf32>
    tpu.vector_store %arg6[%c17, %c0_1], %0 {strides = array<i32>} : memref<18x64xf32, #tpu.memory_space<vmem>>, vector<1x64xf32>,
    %c0_2 = arith.constant 0 : index
    %c0_3 = arith.constant 0 : index
    %c0_4 = arith.constant 0 : index
    %3 = vector.load %arg2[%c0_2, %c0_3, %c0_4] : memref<1x16x64xf32, #tpu.memory_space<vmem>>, vector<1x16x64xf32>
    %4 = vector.shape_cast %3 : vector<1x16x64xf32> to vector<16x64xf32>
    %c1 = arith.constant 1 : index
    %c0_5 = arith.constant 0 : index
    %5 = vector.load %arg6[%c1, %c0_5] : memref<18x64xf32, #tpu.memory_space<vmem>>, vector<16x64xf32>
    tpu.vector_store %arg6[%c1, %c0_5], %4 {strides = array<i32>} : memref<18x64xf32, #tpu.memory_space<vmem>>, vector<16x64xf32>,
    %cst_6 = arith.constant 0.000000e+00 : f32
    %6 = vector.broadcast %cst_6 : f32 to vector<16x128xf32>
    %c0_i32 = arith.constant 0 : i32
    %7 = arith.addi %arg1, %c0_i32 : i32
    %8 = arith.index_cast %7 : i32 to index
    %c0_7 = arith.constant 0 : index
    %9 = vector.load %arg6[%8, %c0_7] : memref<18x64xf32, #tpu.memory_space<vmem>>, vector<16x64xf32>
    %c0_8 = arith.constant 0 : index
    %c0_9 = arith.constant 0 : index
    %c0_10 = arith.constant 0 : index
    %c0_11 = arith.constant 0 : index
    %10 = vector.load %arg3[%c0_8, %c0_9, %c0_10, %c0_11] : memref<1x2x64x128xf32, #tpu.memory_space<vmem>>, vector<1x1x64x128xf32>
    %11 = vector.shape_cast %10 : vector<1x1x64x128xf32> to vector<64x128xf32>
    %cst_12 = arith.constant dense<0.000000e+00> : vector<16x128xf32>
    %12 = tpu.matmul %9, %11, %cst_12 {dimension_numbers = #tpu.dot_dimension_numbers<[1], [0], [0], [1], [0, 0, 1, 1], [], []>} : vector<16x64xf32>, vector<64x128xf32>, vector<16x128xf32> -> vector<16x128xf32>
    %13 = arith.addf %6, %12 : vector<16x128xf32>
    %c1_i32 = arith.constant 1 : i32
    %14 = arith.addi %arg1, %c1_i32 : i32
    %15 = arith.index_cast %14 : i32 to index
    %c0_13 = arith.constant 0 : index
    %16 = vector.load %arg6[%15, %c0_13] : memref<18x64xf32, #tpu.memory_space<vmem>>, vector<16x64xf32>
    %c0_14 = arith.constant 0 : index
    %c1_15 = arith.constant 1 : index
    %c0_16 = arith.constant 0 : index
    %c0_17 = arith.constant 0 : index
    %17 = vector.load %arg3[%c0_14, %c1_15, %c0_16, %c0_17] : memref<1x2x64x128xf32, #tpu.memory_space<vmem>>, vector<1x1x64x128xf32>
    %18 = vector.shape_cast %17 : vector<1x1x64x128xf32> to vector<64x128xf32>
    %cst_18 = arith.constant dense<0.000000e+00> : vector<16x128xf32>
    %19 = tpu.matmul %16, %18, %cst_18 {dimension_numbers = #tpu.dot_dimension_numbers<[1], [0], [0], [1], [0, 0, 1, 1], [], []>} : vector<16x64xf32>, vector<64x128xf32>, vector<16x128xf32> -> vector<16x128xf32>
    %20 = arith.addf %13, %19 : vector<16x128xf32>
    %c0_19 = arith.constant 0 : index
    %c0_20 = arith.constant 0 : index
    %21 = vector.load %arg4[%c0_19, %c0_20] : memref<1x128xf32, #tpu.memory_space<vmem>>, vector<1x128xf32>
    %22 = vector.broadcast %21 : vector<1x128xf32> to vector<16x128xf32>
    %23 = arith.addf %20, %22 : vector<16x128xf32>
    %c0_21 = arith.constant 0 : index
    %c0_22 = arith.constant 0 : index
    %c0_23 = arith.constant 0 : index
    %24 = vector.load %arg5[%c0_21, %c0_22, %c0_23] : memref<1x16x128xf32, #tpu.memory_space<vmem>>, vector<1x16x128xf32>
    %25 = vector.shape_cast %24 : vector<1x16x128xf32> to vector<16x128xf32>
    %26 = vector.shape_cast %23 : vector<16x128xf32> to vector<1x16x128xf32>
    tpu.vector_store %arg5[%c0_21, %c0_22, %c0_23], %26 {strides = array<i32>} : memref<1x16x128xf32, #tpu.memory_space<vmem>>, vector<1x16x128xf32>,
    return
  }
  func.func @transform_0(%arg0: i32, %arg1: i32) -> (i32, i32, i32) {
    %c0_i32 = arith.constant 0 : i32
    %c0_i32_0 = arith.constant 0 : i32
    %c0_i32_1 = arith.constant 0 : i32
    return %arg0, %c0_i32, %c0_i32_0 : i32, i32, i32
  }
  func.func @transform_1(%arg0: i32, %arg1: i32) -> (i32, i32, i32, i32) {
    %c0_i32 = arith.constant 0 : i32
    %c0_i32_0 = arith.constant 0 : i32
    %c0_i32_1 = arith.constant 0 : i32
    %c0_i32_2 = arith.constant 0 : i32
    return %arg1, %c0_i32, %c0_i32_0, %c0_i32_1 : i32, i32, i32, i32
  }
  func.func @transform_2(%arg0: i32, %arg1: i32) -> (i32, i32) {
    %c0_i32 = arith.constant 0 : i32
    %c0_i32_0 = arith.constant 0 : i32
    %c0_i32_1 = arith.constant 0 : i32
    return %c0_i32, %c0_i32_0 : i32, i32
  }
  func.func @transform_3(%arg0: i32, %arg1: i32) -> (i32, i32, i32) {
    %c0_i32 = arith.constant 0 : i32
    %c0_i32_0 = arith.constant 0 : i32
    return %arg0, %c0_i32, %arg1 : i32, i32, i32
  }
}

</mosaic_0001>

<bundles_post_ra>
// kernel: tile.8
= control target key start
LH: loop header
LB: loop body
LE: loop exit
PB: predicated region body
PF: predicated region fallthrough
CT: control target
= control target key end

     0   :  { %s40_s0 = inlined_call_operand.vmem [shape: f32[4], index: 0, kind: input, shape index: {}]   ;;  %s41_s1 = inlined_call_operand.vmem [shape: f32[32,4], index: 1, kind: output, shape index: {}]  }
   0x1   :  { %v4_v0 = vld [vmem:[%s40_s0] ss:$0 sm:$0xff] }
   0x2   :  { %5 = vst [vmem:[%s41_s1] sm:$0xff] %v4_v0  ;;  %12 = vst [vmem:[%s41_s1 + $0x8] sm:$0xff] %v4_v0 }
   0x3   :  { %13 = vst [vmem:[%s41_s1 + $0x10] sm:$0xff] %v4_v0  ;;  %14 = vst [vmem:[%s41_s1 + $0x18] sm:$0xff] %v4_v0 }

// kernel: tile.9
= control target key start
LH: loop header
LB: loop body
LE: loop exit
PB: predicated region body
PF: predicated region fallthrough
CT: control target
= control target key end

     0   :  { %s259_s10 = smov 124   ;;  %s260_s11 = smov 116   ;;  %vm3_vm0 = vcmask 31744   ;;  %vm9_vm1 = vcmask 1048544   ;;  %vm15_vm2 = vcmask 1015744   ;;  %vm21_vm3 = vcmask 982944   ;;  %s399_s0 = inlined_call_operand.vmem [shape: f32[32,4], index: 0, kind: input, shape index: {}]   ;;  %s400_s1 = inlined_call_operand.vmem [shape: f32[1,128], index: 1, kind: output, shape index: {}]  }
   0x1   :  { %v197_v0 = vld [vmem:[%s399_s0 + $0x1f] sm:$0x1]   ;;  %v199_v1 = vld [vmem:[%s399_s0 + $0x1d] sm:$0x1]   ;;  %v198_v2 = vld [vmem:[%s399_s0 + $0x1e] sm:$0x1]  }
   0x2   :  { %7 = vrot.lane.b32.xlu0 %v197_v0, %s259_s10  ;;  %19 = vrot.lane.b32.xlu1 %v199_v1, %s260_s11  ;;  %v200_v3 = vld [vmem:[%s399_s0 + $0x1c] sm:$0x1]   ;;  %s261_s16 = smov 120   ;;  %s262_s17 = smov 112   ;;  %v201_v4 = vld [vmem:[%s399_s0 + $0x1b] sm:$0x1]  }
   0x3   :  { %v202_v5 = vld [vmem:[%s399_s0 + $0x1a] sm:$0x1]   ;;  %s263_s22 = smov 108   ;;  %s264_s23 = smov 104   ;;  %v203_v6 = vld [vmem:[%s399_s0 + $0x19] sm:$0x1]  }
   0x4   :  { %v204_v7 = vld [vmem:[%s399_s0 + $0x18] sm:$0x1]   ;;  %s265_s28 = smov 100   ;;  %s266_s29 = smov 96   ;;  %v205_v8 = vld [vmem:[%s399_s0 + $0x17] sm:$0x1]  }
   0x5   :  { %v206_v9 = vld [vmem:[%s399_s0 + $0x16] sm:$0x1]   ;;  %v2_v10 = vld [vmem:[%s399_s0] sm:$0x1]   ;;  %s267_s7 = smov 92   ;;  %s268_s8 = smov 88  }
   0x6   :  { %13 = vrot.lane.b32.xlu0 %v198_v2, %s261_s16  ;;  %25 = vrot.lane.b32.xlu1 %v200_v3, %s262_s17  ;;  %4 = vst.msk [vmem:[#allocation0] sm:$0x1] %vm3_vm0, %v2_v10   ;;  %v207_v11 = vld [vmem:[%s399_s0 + $0x15] sm:$0x1]   ;;  %v208_v12 = vld [vmem:[%s399_s0 + $0x14] sm:$0x1]  }
   0x7   :  { %s269_s13 = smov 84   ;;  %s270_s14 = smov 80   ;;  %v209_v13 = vld [vmem:[%s399_s0 + $0x13] sm:$0x1]   ;;  %v210_v14 = vld [vmem:[%s399_s0 + $0x12] sm:$0x1]  }
   0x8   :  { %s271_s19 = smov 76   ;;  %s272_s20 = smov 72   ;;  %v211_v15 = vld [vmem:[%s399_s0 + $0x11] sm:$0x1]   ;;  %v212_v16 = vld [vmem:[%s399_s0 + $0x10] sm:$0x1]  }
   0x9   :  { %s273_s25 = smov 68   ;;  %s274_s26 = smov 64   ;;  %v213_v17 = vld [vmem:[%s399_s0 + $0xf] sm:$0x1]   ;;  %v214_v18 = vld [vmem:[%s399_s0 + $0xe] sm:$0x1]  }
   0xa   :  { %31 = vrot.lane.b32.xlu0 %v201_v4, %s263_s22  ;;  %37 = vrot.lane.b32.xlu1 %v202_v5, %s264_s23  ;;  %s275_s2 = smov 60   ;;  %s276_s3 = smov 56   ;;  %v215_v19 = vld [vmem:[%s399_s0 + $0xd] sm:$0x1]   ;;  %v216_v20 = vld [vmem:[%s399_s0 + $0xc] sm:$0x1]  }
   0xb   :  { %s278_s9 = smov 48   ;;  %v217_v21 = vld [vmem:[%s399_s0 + $0xb] sm:$0x1]   ;;  %v218_v22 = vld [vmem:[%s399_s0 + $0xa] sm:$0x1]   ;;  %s280_s15 = smov 40  }
   0xc   :  { %v219_v23 = vld [vmem:[%s399_s0 + $0x9] sm:$0x1]   ;;  %v220_v24 = vld [vmem:[%s399_s0 + $0x8] sm:$0x1]   ;;  %s282_s21 = smov 32   ;;  %s284_s27 = smov 24  }
   0xd   :  { %v221_v25 = vld [vmem:[%s399_s0 + $0x7] sm:$0x1]   ;;  %v222_v26 = vld [vmem:[%s399_s0 + $0x6] sm:$0x1]   ;;  %v223_v27 = vld [vmem:[%s399_s0 + $0x5] sm:$0x1]  }
   0xe   :  { %43 = vrot.lane.b32.xlu0 %v203_v6, %s265_s28  ;;  %49 = vrot.lane.b32.xlu1 %v204_v7, %s266_s29  ;;  %v224_v28 = vld [vmem:[%s399_s0 + $0x4] sm:$0x1]   ;;  %s286_s4 = smov 16   ;;  %v225_v29 = vld [vmem:[%s399_s0 + $0x3] sm:$0x1]   ;;  %s288_s10 = smov 8  }
   0xf   :  { %v226_v30 = vld [vmem:[%s399_s0 + $0x2] sm:$0x1]   ;;  %v227_v31 = vld [vmem:[%s399_s0 + $0x1] sm:$0x1]   ;;  %s289_s0 = smov 4   ;;  %vm27_vm4 = vcmask 950144  }
  0x10   :  { %vm33_vm5 = vcmask 917344   ;;  %vm39_vm6 = vcmask 884544   ;;  %vm45_vm7 = vcmask 851744   ;;  %vm51_vm8 = vcmask 818944  }
  0x11   :  { %vm57_vm9 = vcmask 786144   ;;  %vm63_vm10 = vcmask 753344   ;;  %vm69_vm11 = vcmask 720544   ;;  %vm75_vm12 = vcmask 687744  }
  0x12   :  { %55 = vrot.lane.b32.xlu0 %v205_v8, %s267_s7  ;;  %61 = vrot.lane.b32.xlu1 %v206_v9, %s268_s8  ;;  %s277_s8 = smov 52   ;;  %vm81_vm13 = vcmask 654944   ;;  %vm87_vm14 = vcmask 622144   ;;  %vm93_vm15 = vcmask 589344   ;;  %vm99_vm0 = vcmask 556544  }
  0x16   :  { %67 = vrot.lane.b32.xlu0 %v207_v11, %s269_s13  ;;  %73 = vrot.lane.b32.xlu1 %v208_v12, %s270_s14  ;;  %s279_s14 = smov 44  }
  0x1a   :  { %79 = vrot.lane.b32.xlu0 %v209_v13, %s271_s19  ;;  %85 = vrot.lane.b32.xlu1 %v210_v14, %s272_s20  ;;  %s281_s20 = smov 36  }
  0x1e   :  { %91 = vrot.lane.b32.xlu0 %v211_v15, %s273_s25  ;;  %97 = vrot.lane.b32.xlu1 %v212_v16, %s274_s26  ;;  %s283_s26 = smov 28  }
  0x22   :  { %103 = vrot.lane.b32.xlu0 %v213_v17, %s275_s2  ;;  %109 = vrot.lane.b32.xlu1 %v214_v18, %s276_s3  ;;  %s285_s3 = smov 20  }
  0x26   :  { %115 = vrot.lane.b32.xlu0 %v215_v19, %s277_s8  ;;  %121 = vrot.lane.b32.xlu1 %v216_v20, %s278_s9  ;;  %s287_s9 = smov 12  }
  0x2a   :  { %127 = vrot.lane.b32.xlu0 %v217_v21, %s279_s14  ;;  %133 = vrot.lane.b32.xlu1 %v218_v22, %s280_s15 }
  0x2e   :  { %139 = vrot.lane.b32.xlu0 %v219_v23, %s281_s20  ;;  %145 = vrot.lane.b32.xlu1 %v220_v24, %s282_s21 }
  0x32   :  { %151 = vrot.lane.b32.xlu0 %v221_v25, %s283_s26  ;;  %157 = vrot.lane.b32.xlu1 %v222_v26, %s284_s27 }
  0x36   :  { %163 = vrot.lane.b32.xlu0 %v223_v27, %s285_s3  ;;  %169 = vrot.lane.b32.xlu1 %v224_v28, %s286_s4 }
  0x3a   :  { %175 = vrot.lane.b32.xlu0 %v225_v29, %s287_s9  ;;  %181 = vrot.lane.b32.xlu1 %v226_v30, %s288_s10 }
  0x3e   :  { %187 = vrot.lane.b32.xlu0 %v227_v31, %s289_s0 }
  0x74   :  { %v8_v32 = vpop.permute.xlu0 %7   ;;  %v20_v33 = vpop.permute.xlu1 %19  }
  0x75   :  { %10 = vst.msk [vmem:[#allocation0] sm:$0x1] %vm9_vm1, %v8_v32   ;;  %vm105_vm1 = vcmask 523744  }
  0x78   :  { %v14_v34 = vpop.permute.xlu0 %13   ;;  %v26_v35 = vpop.permute.xlu1 %25  }
  0x79   :  { %16 = vst.msk [vmem:[#allocation0] sm:$0x1] %vm15_vm2, %v14_v34   ;;  %vm111_vm2 = vcmask 490944  }
  0x7a   :  { %22 = vst.msk [vmem:[#allocation0] sm:$0x1] %vm21_vm3, %v20_v33   ;;  %vm117_vm3 = vcmask 458144  }
  0x7b   :  { %28 = vst.msk [vmem:[#allocation0] sm:$0x1] %vm27_vm4, %v26_v35   ;;  %vm123_vm4 = vcmask 425344  }
  0x7c   :  { %v32_v36 = vpop.permute.xlu0 %31   ;;  %v38_v37 = vpop.permute.xlu1 %37  }
  0x7d   :  { %34 = vst.msk [vmem:[#allocation0] sm:$0x1] %vm33_vm5, %v32_v36   ;;  %vm129_vm5 = vcmask 392544  }
  0x7e   :  { %40 = vst.msk [vmem:[#allocation0] sm:$0x1] %vm39_vm6, %v38_v37   ;;  %vm135_vm6 = vcmask 359744  }
  0x80   :  { %v44_v38 = vpop.permute.xlu0 %43   ;;  %v50_v39 = vpop.permute.xlu1 %49  }
  0x81   :  { %46 = vst.msk [vmem:[#allocation0] sm:$0x1] %vm45_vm7, %v44_v38   ;;  %vm141_vm7 = vcmask 326944  }
  0x82   :  { %52 = vst.msk [vmem:[#allocation0] sm:$0x1] %vm51_vm8, %v50_v39   ;;  %vm147_vm8 = vcmask 294144  }
  0x84   :  { %v56_v40 = vpop.permute.xlu0 %55   ;;  %v62_v41 = vpop.permute.xlu1 %61  }
  0x85   :  { %58 = vst.msk [vmem:[#allocation0] sm:$0x1] %vm57_vm9, %v56_v40   ;;  %vm153_vm9 = vcmask 261344  }
  0x86   :  { %64 = vst.msk [vmem:[#allocation0] sm:$0x1] %vm63_vm10, %v62_v41   ;;  %vm159_vm10 = vcmask 228544  }
  0x88   :  { %v68_v42 = vpop.permute.xlu0 %67   ;;  %v74_v43 = vpop.permute.xlu1 %73  }
  0x89   :  { %70 = vst.msk [vmem:[#allocation0] sm:$0x1] %vm69_vm11, %v68_v42   ;;  %vm165_vm11 = vcmask 195744  }
  0x8a   :  { %76 = vst.msk [vmem:[#allocation0] sm:$0x1] %vm75_vm12, %v74_v43   ;;  %vm171_vm12 = vcmask 162944  }
  0x8c   :  { %v80_v44 = vpop.permute.xlu0 %79   ;;  %v86_v45 = vpop.permute.xlu1 %85  }
  0x8d   :  { %82 = vst.msk [vmem:[#allocation0] sm:$0x1] %vm81_vm13, %v80_v44   ;;  %vm177_vm13 = vcmask 130144  }
  0x8e   :  { %88 = vst.msk [vmem:[#allocation0] sm:$0x1] %vm87_vm14, %v86_v45   ;;  %vm183_vm14 = vcmask 97344  }
  0x90   :  { %v92_v46 = vpop.permute.xlu0 %91   ;;  %v98_v47 = vpop.permute.xlu1 %97  }
  0x91   :  { %94 = vst.msk [vmem:[#allocation0] sm:$0x1] %vm93_vm15, %v92_v46   ;;  %vm189_vm15 = vcmask 64544  }
  0x92   :  { %100 = vst.msk [vmem:[#allocation0] sm:$0x1] %vm99_vm0, %v98_v47  }
  0x94   :  { %v104_v48 = vpop.permute.xlu0 %103   ;;  %v110_v49 = vpop.permute.xlu1 %109  }
  0x95   :  { %106 = vst.msk [vmem:[#allocation0] sm:$0x1] %vm105_vm1, %v104_v48  }
  0x96   :  { %112 = vst.msk [vmem:[#allocation0] sm:$0x1] %vm111_vm2, %v110_v49  }
  0x98   :  { %v116_v50 = vpop.permute.xlu0 %115   ;;  %v122_v51 = vpop.permute.xlu1 %121  }
  0x99   :  { %118 = vst.msk [vmem:[#allocation0] sm:$0x1] %vm117_vm3, %v116_v50  }
  0x9a   :  { %124 = vst.msk [vmem:[#allocation0] sm:$0x1] %vm123_vm4, %v122_v51  }
  0x9c   :  { %v128_v52 = vpop.permute.xlu0 %127   ;;  %v134_v53 = vpop.permute.xlu1 %133  }
  0x9d   :  { %130 = vst.msk [vmem:[#allocation0] sm:$0x1] %vm129_vm5, %v128_v52  }
  0x9e   :  { %136 = vst.msk [vmem:[#allocation0] sm:$0x1] %vm135_vm6, %v134_v53  }
  0xa0   :  { %v140_v54 = vpop.permute.xlu0 %139   ;;  %v146_v55 = vpop.permute.xlu1 %145  }
  0xa1   :  { %142 = vst.msk [vmem:[#allocation0] sm:$0x1] %vm141_vm7, %v140_v54  }
  0xa2   :  { %148 = vst.msk [vmem:[#allocation0] sm:$0x1] %vm147_vm8, %v146_v55  }
  0xa4   :  { %v152_v56 = vpop.permute.xlu0 %151   ;;  %v158_v57 = vpop.permute.xlu1 %157  }
  0xa5   :  { %154 = vst.msk [vmem:[#allocation0] sm:$0x1] %vm153_vm9, %v152_v56  }
  0xa6   :  { %160 = vst.msk [vmem:[#allocation0] sm:$0x1] %vm159_vm10, %v158_v57  }
  0xa8   :  { %v164_v58 = vpop.permute.xlu0 %163   ;;  %v170_v59 = vpop.permute.xlu1 %169  }
  0xa9   :  { %166 = vst.msk [vmem:[#allocation0] sm:$0x1] %vm165_vm11, %v164_v58  }
  0xaa   :  { %172 = vst.msk [vmem:[#allocation0] sm:$0x1] %vm171_vm12, %v170_v59  }
  0xac   :  { %v176_v60 = vpop.permute.xlu0 %175   ;;  %v182_v61 = vpop.permute.xlu1 %181  }
  0xad   :  { %178 = vst.msk [vmem:[#allocation0] sm:$0x1] %vm177_vm13, %v176_v60  }
  0xae   :  { %184 = vst.msk [vmem:[#allocation0] sm:$0x1] %vm183_vm14, %v182_v61  }
  0xb0   :  { %v188_v62 = vpop.permute.xlu0 %187  }
  0xb1   :  { %190 = vst.msk [vmem:[#allocation0] sm:$0x1] %vm189_vm15, %v188_v62  }
  0xb8   :  { %v194_v63 = vld [vmem:[#allocation0] sm:$0x1] }
  0xb9   :  { %196 = vst [vmem:[%s400_s1] sm:$0x1] %v194_v63 }

// kernel: upsample_forward.1
= control target key start
LH: loop header
LB: loop body
LE: loop exit
PB: predicated region body
PF: predicated region fallthrough
CT: control target
= control target key end

     0   :  { %s788_s12 = smov 0   ;;  %s790_s13 = smov 0   ;;  %s914_s0 = inlined_call_operand.vmem [shape: f32[2,16,64], index: 0, kind: input, shape index: {}]   ;;  %s915_s1 = inlined_call_operand.vmem [shape: f32[2,2,64,128], index: 1, kind: input, shape index: {}]   ;;  %s916_s2 = inlined_call_operand.vmem [shape: f32[1,128], index: 2, kind: input, shape index: {}]   ;;  %s917_s3 = inlined_call_operand.vmem [shape: f32[2,16,256], index: 3, kind: output, shape index: {}]  }
   0x1   :  { %s792_s14 = smov 0   ;;  %s794_s15 = smov 0  }
   0x2   :  { %s796_s16 = smov 0   ;;  %s798_s17 = smov 0  }
   0x3   :  { %s800_s18 = smov 0  }
   0x4 LB: > { %s22_s19 = sadd.s32 1, %s757_s16  ;;  %s25_s20 = sadd.s32 1, %s761_s17  ;;  %s765_s18 = sphi %s800_s18, %s13_s18   ;;  %s761_s17 = sphi %s798_s17, %s924_s17   ;;  %s757_s16 = sphi %s796_s16, %s923_s16   ;;  %s753_s15 = sphi %s794_s15, %s922_s15   ;;  %s749_s14 = sphi %s792_s14, %s921_s14   ;;  %s745_s13 = sphi %s790_s13, %s920_s13   ;;  %s741_s12 = sphi %s788_s12, %s919_s12  }
   0x5   : > { %p23_p0 = scmp.ge.s32.totalorder %s22_s19, 2  ;;  %s530_s21 = sadd.s32 4294967295, %s765_s18  }
   0x6   : > { %p117_p1 = scmp.ne.s32.totalorder %s745_s13, %s741_s12  ;;  %p118_p2 = scmp.eq.s32.totalorder %s530_s21, 3 }
   0x7   : > { %s926_s19 = smov (%p23_p0, %s22_s19), 0  ;;  %s928_s20 = smov (!%p23_p0, %s25_s20), %s761_s17 }
   0x8   : > { %s103_s22 = ssub.s32 %s757_s16, %s926_s19  ;;  %p27_p3 = scmp.ge.s32.totalorder %s928_s20, 2 }
   0x9   : > { %p534_p4 = scmp.ge.s32.totalorder %s765_s18, 1  ;;  %p834_p5 = por %p118_p2, %p117_p1 }
   0xa   : > { %p161_p6 = scmp.lt.s32.totalorder %s765_s18, 5  ;;  %s930_s20 = smov (%p27_p3, %s928_s20), 0 }
   0xb   : > { %s102_s24 = ssub.s32 %s761_s17, %s930_s20  ;;  %s107_s26 = sadd.s32 1, %s745_s13 }
   0xc   : > { %p162_p7 = pnand %p534_p4, %p161_p6  ;;  %s104_s25 = sor.u32 %s103_s22, %s102_s24 }
   0xd   : > { %p105_p8 = scmp.eq.s32.totalorder %s104_s25, 0  ;;  %p194_p9 = scmp.lt.s32.totalorder (!%p162_p7), %s749_s14, 1  ;;  %vm199_vm0 = vcmask (!%p162_p7), 516096   ;;  %v767_v0 = vmov (!%p162_p7), 0.0   ;;  %vm204_vm1 = vcmask (!%p162_p7), 523264  }
   0xe   : > { %165 = sbr.rel (%p162_p7) target bundleno = 271 (0x10f), region = 32  ;;  %p189_p10 = scmp.lt.s32.totalorder (!%p162_p7), %s753_s15, 1  ;;  %200 = vst.msk [vmem:[#allocation2] sm:$0x1] (!%p162_p7), %vm199_vm0, %v767_v0  ;;  %201 = vst.msk [vmem:[#allocation2 + $0x11] sm:$0x1] (!%p162_p7), %vm199_vm0, %v767_v0 }
   0xf   : > { %s845_s27 = scalar_select %p105_p8, %s745_s13, %s107_s26  }
  0x10   : > { %s207_s11 = scalar_lea.vmem (!%p162_p7), [#allocation2], %s749_s14  ;;  %s186_s21 = sand.u32 (!%p162_p7), 1, %s741_s12   ;;  %v554_v33 = vld [vmem:[%s916_s2] ss:$0 sm:$0xff] (!%p162_p7) }
  0x11   : > { %s535_s22 = sshll.u32 (!%p162_p7), %s186_s21, 4 }
  0x12   : > { %s188_s26 = scalar_lea.vmem (!%p162_p7), [#allocation3], %s535_s22 }
  0x15   : > { %s195_s28 = scalar_select %p194_p9, %s749_s14, 1 }
  0x16   : > { %s190_s29 = scalar_select %p189_p10, %s753_s15, 1 }
  0x17   : > { %s561_s30 = sshll.u32 %s195_s28, 7  ;;  %s556_s12 = sshll.u32 (%p834_p5), %s753_s15, 2 }
  0x18   : > { %s854_s6 = scalar_lea.vmem %s915_s1, %s561_s30  ;;  %s560_s7 = sshll.u32 %s190_s29, 4 }
  0x19   : > { %v542_v1 = vld [vmem:[%s854_s6 + $0x40] sm:$0xff]  ;;  %v543_v2 = vld [vmem:[%s854_s6 + $0x48] sm:$0xff]  ;;  %v544_v6 = vld [vmem:[%s854_s6 + $0x50] sm:$0xff]  ;;  %s193_s10 = scalar_lea.vmem %s914_s0, %s560_s7  ;;  %s412_s28 = sadd.s32 (%p834_p5), %s749_s14, %s556_s12 }
  0x1a   : > { %v210_v3 = vld [vmem:[%s854_s6] sm:$0xff]  ;;  %v620_v4 = vpack.c.bf16 %v543_v2, %v542_v1  ;;  %v211_v5 = vld [vmem:[%s854_s6 + $0x8] sm:$0xff]  ;;  %v545_v7 = vld [vmem:[%s854_s6 + $0x58] sm:$0xff]  ;;  %s557_s29 = sshll.u32 (%p834_p5), %s412_s28, 3 }
  0x1b   : > { %v636_v8 = vpack.c.bf16 %v211_v5, %v210_v3  ;;  %v624_v9 = vpack.c.bf16 %v545_v7, %v544_v6  ;;  %v212_v10 = vld [vmem:[%s854_s6 + $0x10] sm:$0xff]  ;;  %v213_v11 = vld [vmem:[%s854_s6 + $0x18] sm:$0xff]  ;;  %v546_v12 = vld [vmem:[%s854_s6 + $0x60] sm:$0xff]  ;;  %s414_s5 = scalar_lea.vmem (%p834_p5), %s917_s3, %s557_s29 }
  0x1c   : > { %621 = vmatprep.subr.bf16.mxu1 %v620_v4  ;;  %v640_v13 = vpack.c.bf16 %v213_v11, %v212_v10  ;;  %v547_v14 = vld [vmem:[%s854_s6 + $0x68] sm:$0xff]  ;;  %v214_v15 = vld [vmem:[%s854_s6 + $0x20] sm:$0xff]  ;;  %v548_v21 = vld [vmem:[%s854_s6 + $0x70] sm:$0xff] }
  0x1d   : > { %v215_v16 = vld [vmem:[%s854_s6 + $0x28] sm:$0xff]  ;;  %637 = vmatprep.subr.bf16.mxu0 %v636_v8  ;;  %623 = vmatpush3.bf16.msra.mxu1 %v620_v4  ;;  %v628_v17 = vpack.c.bf16 %v547_v14, %v546_v12  ;;  %v202_v18 = vld [vmem:[%s193_s10] sm:$0xff]  ;;  %v549_v22 = vld [vmem:[%s854_s6 + $0x78] sm:$0xff] }
  0x1e   : > { %639 = vmatpush3.bf16.msra.mxu0 %v636_v8  ;;  %625 = vmatprep.subr.bf16.mxu1 %v624_v9  ;;  %v203_v19 = vld [vmem:[%s193_s10 + $0x8] sm:$0xff]  ;;  %v644_v20 = vpack.c.bf16 %v215_v16, %v214_v15  ;;  %205 = vst.msk [vmem:[#allocation2 + $0x1] sm:$0xff] %vm204_vm1, %v202_v18  ;;  %v216_v23 = vld [vmem:[%s854_s6 + $0x30] sm:$0xff]  ;;  %v217_v24 = vld [vmem:[%s854_s6 + $0x38] sm:$0xff]  ;;  %v632_v25 = vpack.c.bf16 %v549_v22, %v548_v21 }
  0x1f   : > { %641 = vmatprep.subr.bf16.mxu0 %v640_v13  ;;  %206 = vst.msk [vmem:[#allocation2 + $0x9] sm:$0xff] %vm204_vm1, %v203_v19  ;;  %v648_v26 = vpack.c.bf16 %v217_v24, %v216_v23 }
  0x21   : > { %627 = vmatpush3.bf16.msra.mxu1 %v624_v9 }
  0x22   : > { %643 = vmatpush3.bf16.msra.mxu0 %v640_v13  ;;  %629 = vmatprep.subr.bf16.mxu1 %v628_v17 }
  0x23   : > { %645 = vmatprep.subr.bf16.mxu0 %v644_v20 }
  0x25   : > { %631 = vmatpush3.bf16.msra.mxu1 %v628_v17 }
  0x26   : > { %647 = vmatpush3.bf16.msra.mxu0 %v644_v20  ;;  %633 = vmatprep.subr.bf16.mxu1 %v632_v25  ;;  %v540_v27 = vld [vmem:[%s207_s11 + $0x1] sm:$0xff]  ;;  %v541_v29 = vld [vmem:[%s207_s11 + $0x9] sm:$0xff] }
  0x27   : > { %v208_v28 = vld [vmem:[%s207_s11] sm:$0xff]  ;;  %649 = vmatprep.subr.bf16.mxu0 %v648_v26  ;;  %598 = vmatprep.mubr.msk.f32.mxu1 %vm204_vm1, %v540_v27  ;;  %v209_v30 = vld [vmem:[%s207_s11 + $0x8] sm:$0xff] }
  0x28   : > { %617 = vmatprep.mubr.msk.f32.mxu0 %vm204_vm1, %v208_v28 }
  0x29   : > { %635 = vmatpush3.bf16.msra.mxu1 %v632_v25 }
  0x2a   : > { %651 = vmatpush3.bf16.msra.mxu0 %v648_v26 }
  0x2c   : > { %599 = vmatmul.mubr.msk.f32.vlgmr.msra.gmra.mrb[0].mxu1 %vm204_vm1, %v541_v29 }
  0x2d   : > { %618 = vmatmul.mubr.msk.f32.vlgmr.msra.gmra.mrb[0].mxu0 %vm204_vm1, %v209_v30 }
  0xff   : > { %v600_v31 = vpop.f32.mrb[0].mxu1 }
 0x100   : > { %v619_v32 = vpop.f32.mrb[0].mxu0  ;;  %v303_v34 = vpop.f32.mrb[1].mxu1  ;;  %410 = sbr.rel (!%p834_p5) target bundleno = 271 (0x10f), region = 36 }
 0x101   : > { %v390_v35 = vadd.f32 %v619_v32, %v600_v31  ;;  %v384_v36 = vpop.f32.mrb[1].mxu0 }
 0x102   : > { %v385_v37 = vadd.f32 %v384_v36, %v303_v34 }
 0x103   : > { %v401_v38 = vadd.f32 %v554_v33, %v390_v35 }
 0x104   : > { %v400_v39 = vadd.f32 %v554_v33, %v385_v37 }
 0x105   : > { %403 = vst [vmem:[%s188_s26 + $0x8] sm:$0xff] %v401_v38 }
 0x106   : > { %402 = vst [vmem:[%s188_s26] sm:$0xff] %v400_v39 }
 0x10c   : > { %v446_v41 = vld [vmem:[%s188_s26 + $0x8] sm:$0xff] }
 0x10d   : > { %v444_v40 = vld [vmem:[%s188_s26] sm:$0xff]  ;;  %447 = vst [vmem:[%s414_s5 + $0x10] sm:$0xff] %v446_v41 }
 0x10e   : > { %445 = vst [vmem:[%s414_s5] sm:$0xff] %v444_v40 }
 0x10f PF: > { %s13_s18 = sadd.s32 1, %s765_s18   ;;  %s919_s12 = smov %s745_s13 }
 0x110   : > { %p10_p11 = scmp.ge.s32.totalorder %s13_s18, 6   ;;  %s920_s13 = smov %s845_s27 }
 0x111   : > { %s921_s14 = smov %s757_s16  ;;  %s922_s15 = smov %s761_s17 }
 0x112   : > { %s923_s16 = smov %s926_s19  ;;  %s924_s17 = smov %s930_s20 }
 0x113   :  { %12 = sbr.rel (!%p10_p11) target bundleno = 4 (0x4), region = 106 }

</bundles_post_ra>
